<compile_context>
chip_gen: v7x
topology: tpu7x:2x2x1
jax: 0.10.0
libtpu: 0.0.40
codegen_flags: <defaults>
</compile_context>

<pallas_src>
import jax
import jax.numpy as jnp
from jax import lax
from jax.experimental import pallas as pl
from jax.experimental.pallas import tpu as pltpu


_INV_SQRT2 = 0.7071067811865476
# Conservative across generations: leaves headroom under v7x's 64 MiB physical VMEM,
# while being well above the 16/32 MiB scoped defaults on v5e/v6e.
_VMEM_LIMIT_BYTES = 48 * 1024 * 1024
_TILE_BUDGET_BYTES = 36 * 1024 * 1024


def _round_up(x, m):
    return ((x + m - 1) // m) * m


def _pad2d(a, rows, cols):
    r, c = a.shape
    if r == rows and c == cols:
        return a
    return jnp.pad(a, ((0, rows - r), (0, cols - c)))


def _gelu_exact_f32(h):
    # torch.nn.GELU() default (erf form), computed in f32 on the VPU/EUP.
    return 0.5 * h * (1.0 + lax.erf(h * jnp.float32(_INV_SQRT2)))


def _choose_tiles(rows, d_pad, hidden, itemsize, row_align, row_min):
    """Pick (row_tile, hidden_chunk) fitting a conservative VMEM tile budget."""
    rt = min(512, _round_up(max(rows, row_align), row_align))
    hc = min(512, _round_up(max(hidden, 128), 128))

    def vmem_bytes(rt_, hc_):
        # double-buffered x / w1-chunk / w2-chunk / out tiles + persistent f32 accumulator
        tile_elems = rt_ * d_pad + d_pad * hc_ + hc_ * d_pad + rt_ * d_pad
        return 2 * tile_elems * itemsize + rt_ * d_pad * 4

    while vmem_bytes(rt, hc) > _TILE_BUDGET_BYTES and hc > 128:
        hc = max(128, _round_up(hc // 2, 128))
    while vmem_bytes(rt, hc) > _TILE_BUDGET_BYTES and rt > row_min:
        rt = max(row_min, _round_up(rt // 2, row_align))
    return rt, hc


# ----------------------------------------------------------------------------- kernels

def _mlp_kernel_rows(x_ref, w1_ref, w2_ref, o_ref, acc_ref):
    """side='L' tile: acc += gelu(x_tile @ w1_chunk) @ w2_chunk (contract last axis of x)."""
    k = pl.program_id(1)

    @pl.when(k == 0)
    def _():
        acc_ref[...] = jnp.zeros_like(acc_ref)

    h = jnp.dot(x_ref[...], w1_ref[...], preferred_element_type=jnp.float32)
    h = _gelu_exact_f32(h)
    acc_ref[...] += jnp.dot(h.astype(w2_ref.dtype), w2_ref[...],
                            preferred_element_type=jnp.float32)

    @pl.when(k == pl.num_programs(1) - 1)
    def _():
        o_ref[...] = acc_ref[...].astype(o_ref.dtype)


def _mlp_kernel_cols(x_ref, w1t_ref, w2t_ref, o_ref, acc_ref):
    """side='R' tile: acc += w2t_chunk @ gelu(w1t_chunk @ x_tile) (contract FIRST axis of x).

    This is fn applied over the patch axis without ever transposing the activation in HBM.
    """
    k = pl.program_id(1)

    @pl.when(k == 0)
    def _():
        acc_ref[...] = jnp.zeros_like(acc_ref)

    # (hc, tn) = (hc, D) @ (D, tn)
    h = jnp.dot(w1t_ref[...], x_ref[...], preferred_element_type=jnp.float32)
    h = _gelu_exact_f32(h)
    # (D, tn) += (D, hc) @ (hc, tn)
    acc_ref[...] += jnp.dot(w2t_ref[...], h.astype(w2t_ref.dtype),
                            preferred_element_type=jnp.float32)

    @pl.when(k == pl.num_programs(1) - 1)
    def _():
        o_ref[...] = acc_ref[...].astype(o_ref.dtype)


# ----------------------------------------------------------------------------- wrappers

def _mlp_rows(x2d, w1, w2):
    """y = gelu(x2d @ w1) @ w2 over the last axis of an (M, D) slab."""
    M, D = x2d.shape
    H = w1.shape[1]
    itemsize = jnp.dtype(x2d.dtype).itemsize

    D_pad = _round_up(D, 128)                       # lane-dense output / operands
    tm, hc = _choose_tiles(M, D_pad, H, itemsize, row_align=8, row_min=64)
    M_pad = _round_up(M, tm)
    H_pad = _round_up(H, hc)

    xp = _pad2d(x2d, M_pad, D_pad)
    w1p = _pad2d(w1, D_pad, H_pad)
    w2p = _pad2d(w2, H_pad, D_pad)

    grid = (M_pad // tm, H_pad // hc)
    out = pl.pallas_call(
        _mlp_kernel_rows,
        out_shape=jax.ShapeDtypeStruct((M_pad, D_pad), x2d.dtype),
        grid_spec=pltpu.PrefetchScalarGridSpec(
            num_scalar_prefetch=0,
            grid=grid,
            in_specs=[
                pl.BlockSpec((tm, D_pad), lambda i, k: (i, 0)),     # activation rows
                pl.BlockSpec((D_pad, hc), lambda i, k: (0, k)),     # w1 hidden chunk
                pl.BlockSpec((hc, D_pad), lambda i, k: (k, 0)),     # w2 hidden chunk
            ],
            out_specs=pl.BlockSpec((tm, D_pad), lambda i, k: (i, 0)),
            scratch_shapes=[pltpu.VMEM((tm, D_pad), jnp.float32)],
        ),
        compiler_params=pltpu.CompilerParams(
            dimension_semantics=("parallel", "arbitrary"),
            vmem_limit_bytes=_VMEM_LIMIT_BYTES,
        ),
        cost_estimate=pl.CostEstimate(
            flops=4 * M_pad * D_pad * H_pad,
            transcendentals=M_pad * H_pad,
            bytes_accessed=(xp.size + w1p.size + w2p.size + M_pad * D_pad) * itemsize,
        ),
    )(xp, w1p, w2p)
    return out[:M, :D]


def _mlp_cols(x2d, w1, w2):
    """y = w2^T @ gelu(w1^T @ x2d): the MLP over the FIRST axis of a (D, N) slab."""
    D, N = x2d.shape
    H = w1.shape[1]
    itemsize = jnp.dtype(x2d.dtype).itemsize

    D_pad = _round_up(D, 8)                         # sublane-aligned contraction/out-row dim
    tn, hc = _choose_tiles(N, D_pad, H, itemsize, row_align=128, row_min=128)
    N_pad = _round_up(N, tn)
    H_pad = _round_up(H, hc)

    xp = _pad2d(x2d, D_pad, N_pad)
    # Tiny one-time weight transposes in HBM (weights << activations); keeps the in-kernel
    # matmuls in the plain (M,K)@(K,N) form.
    w1t = _pad2d(w1.T, H_pad, D_pad)                # (4*dim, dim)
    w2t = _pad2d(w2.T, D_pad, H_pad)                # (dim, 4*dim)

    grid = (N_pad // tn, H_pad // hc)
    out = pl.pallas_call(
        _mlp_kernel_cols,
        out_shape=jax.ShapeDtypeStruct((D_pad, N_pad), x2d.dtype),
        grid_spec=pltpu.PrefetchScalarGridSpec(
            num_scalar_prefetch=0,
            grid=grid,
            in_specs=[
                pl.BlockSpec((D_pad, tn), lambda i, k: (0, i)),     # activation columns
                pl.BlockSpec((hc, D_pad), lambda i, k: (k, 0)),     # w1^T hidden chunk
                pl.BlockSpec((D_pad, hc), lambda i, k: (0, k)),     # w2^T hidden chunk
            ],
            out_specs=pl.BlockSpec((D_pad, tn), lambda i, k: (0, i)),
            scratch_shapes=[pltpu.VMEM((D_pad, tn), jnp.float32)],
        ),
        compiler_params=pltpu.CompilerParams(
            dimension_semantics=("parallel", "arbitrary"),
            vmem_limit_bytes=_VMEM_LIMIT_BYTES,
        ),
        cost_estimate=pl.CostEstimate(
            flops=4 * N_pad * D_pad * H_pad,
            transcendentals=N_pad * H_pad,
            bytes_accessed=(xp.size + w1t.size + w2t.size + D_pad * N_pad) * itemsize,
        ),
    )(xp, w1t, w2t)
    return out[:D, :N]


def mixer_mlp_forward(x, w1, w2, side):
    """MixerMlp.forward. x: (n_patches, batch, n_channels); w1=(dim,4dim), w2=(4dim,dim)."""
    if side not in ("L", "R"):
        raise ValueError("side must be either 'L' or 'R'")
    P, B, C = x.shape
    if side == "L":
        y2d = _mlp_rows(x.reshape(P * B, C), w1, w2)
        return y2d.reshape(P, B, C)
    # side == "R": torch.transpose(x, 0, 2) is folded into the contraction axis
    # (contract over patches directly) -> no HBM transpose of the activation.
    y2d = _mlp_cols(x.reshape(P, B * C), w1, w2)
    return y2d.reshape(P, B, C)


# ----------------------------------------------------------------------------- reference

def _reference(x, w1, w2, side):
    """Pure-JAX reference matching the PyTorch module (with explicit transposes)."""
    if side == "R":
        x = jnp.swapaxes(x, 0, 2)
    h = x @ w1
    h = 0.5 * h * (1.0 + lax.erf(h * _INV_SQRT2))
    y = h @ w2
    if side == "R":
        y = jnp.swapaxes(y, 0, 2)
    return y


if __name__ == "__main__":
    key = jax.random.PRNGKey(0)
    k_x, k_wl1, k_wl2, k_wr1, k_wr2, k_x2, k_a, k_b, k_c, k_d = jax.random.split(key, 10)

    # --- Test 1: small MLP-Mixer style activation (n_patches, batch, n_channels) ---
    n_patches, batch, n_channels = 8, 2, 16
    x = jax.random.normal(k_x, (n_patches, batch, n_channels), dtype=jnp.float32)

    dim_L = n_channels
    w1_L = 0.1 * jax.random.normal(k_wl1, (dim_L, 4 * dim_L), dtype=jnp.float32)
    w2_L = 0.1 * jax.random.normal(k_wl2, (4 * dim_L, dim_L), dtype=jnp.float32)

    dim_R = n_patches
    w1_R = 0.1 * jax.random.normal(k_wr1, (dim_R, 4 * dim_R), dtype=jnp.float32)
    w2_R = 0.1 * jax.random.normal(k_wr2, (4 * dim_R, dim_R), dtype=jnp.float32)

    y_L = jax.block_until_ready(mixer_mlp_forward(x, w1_L, w2_L, "L"))
    y_R = jax.block_until_ready(mixer_mlp_forward(x, w1_R, w2_R, "R"))
    assert y_L.shape == x.shape and y_R.shape == x.shape
    assert jnp.allclose(y_L, _reference(x, w1_L, w2_L, "L"), atol=1e-5, rtol=1e-5)
    assert jnp.allclose(y_R, _reference(x, w1_R, w2_R, "R"), atol=1e-5, rtol=1e-5)

    # --- Test 2: slightly larger shapes to exercise multi-tile grid + hidden chunking ---
    n_patches2, batch2, n_channels2 = 16, 4, 160
    x2 = jax.random.normal(k_x2, (n_patches2, batch2, n_channels2), dtype=jnp.float32)
    w1_L2 = 0.05 * jax.random.normal(k_a, (n_channels2, 4 * n_channels2), dtype=jnp.float32)
    w2_L2 = 0.05 * jax.random.normal(k_b, (4 * n_channels2, n_channels2), dtype=jnp.float32)
    w1_R2 = 0.05 * jax.random.normal(k_c, (n_patches2, 4 * n_patches2), dtype=jnp.float32)
    w2_R2 = 0.05 * jax.random.normal(k_d, (4 * n_patches2, n_patches2), dtype=jnp.float32)

    y_L2 = jax.block_until_ready(mixer_mlp_forward(x2, w1_L2, w2_L2, "L"))
    y_R2 = jax.block_until_ready(mixer_mlp_forward(x2, w1_R2, w2_R2, "R"))
    assert y_L2.shape == x2.shape and y_R2.shape == x2.shape
    assert jnp.allclose(y_L2, _reference(x2, w1_L2, w2_L2, "L"), atol=1e-4, rtol=1e-4)
    assert jnp.allclose(y_R2, _reference(x2, w1_R2, w2_R2, "R"), atol=1e-4, rtol=1e-4)

    print("KERNEL_OK")
</pallas_src>

<mosaic_0001>
module attributes {stable_mosaic.version = 11 : i64} {
  func.func @_mlp_kernel_rows(%arg0: i32, %arg1: i32, %arg2: memref<16x128xf32, #tpu.memory_space<vmem>>, %arg3: memref<128x128xf32, #tpu.memory_space<vmem>>, %arg4: memref<128x128xf32, #tpu.memory_space<vmem>>, %arg5: memref<16x128xf32, #tpu.memory_space<vmem>>, %arg6: memref<16x128xf32, #tpu.memory_space<vmem>>) attributes {dimension_semantics = [#tpu.dimension_semantics<parallel>, #tpu.dimension_semantics<arbitrary>], iteration_bounds = array<i64: 1, 1>, scalar_prefetch = 0 : i64, scratch_operands = 1 : i64, tpu.core_type = #tpu.core_type<tc>, window_params = [{transform_indices = @transform_0, window_bounds = array<i64: 16, 128>}, {transform_indices = @transform_1, window_bounds = array<i64: 128, 128>}, {transform_indices = @transform_2, window_bounds = array<i64: 128, 128>}, {transform_indices = @transform_3, window_bounds = array<i64: 16, 128>}]} {
    %c0_i32 = arith.constant 0 : i32
    %0 = arith.cmpi eq, %arg1, %c0_i32 : i32
    %1 = arith.extui %0 : i1 to i32
    %c0_i32_0 = arith.constant 0 : i32
    %2 = arith.cmpi ne, %1, %c0_i32_0 : i32
    scf.if %2 {
      %cst_16 = arith.constant 0.000000e+00 : f32
      %22 = vector.broadcast %cst_16 : f32 to vector<16x128xf32>
      %c0_17 = arith.constant 0 : index
      %c0_18 = arith.constant 0 : index
      %23 = vector.load %arg6[%c0_17, %c0_18] : memref<16x128xf32, #tpu.memory_space<vmem>>, vector<16x128xf32>
      tpu.vector_store %arg6[%c0_17, %c0_18], %22 {strides = array<i32>} : memref<16x128xf32, #tpu.memory_space<vmem>>, vector<16x128xf32>,
    } else {
    }
    %c0 = arith.constant 0 : index
    %c0_1 = arith.constant 0 : index
    %3 = vector.load %arg2[%c0, %c0_1] : memref<16x128xf32, #tpu.memory_space<vmem>>, vector<16x128xf32>
    %c0_2 = arith.constant 0 : index
    %c0_3 = arith.constant 0 : index
    %4 = vector.load %arg3[%c0_2, %c0_3] : memref<128x128xf32, #tpu.memory_space<vmem>>, vector<128x128xf32>
    %cst = arith.constant dense<0.000000e+00> : vector<16x128xf32>
    %5 = tpu.matmul %3, %4, %cst {dimension_numbers = #tpu.dot_dimension_numbers<[1], [0], [0], [1], [0, 0, 1, 1], [], []>} : vector<16x128xf32>, vector<128x128xf32>, vector<16x128xf32> -> vector<16x128xf32>
    %cst_4 = arith.constant 5.000000e-01 : f32
    %6 = vector.broadcast %cst_4 : f32 to vector<16x128xf32>
    %7 = arith.mulf %6, %5 : vector<16x128xf32>
    %cst_5 = arith.constant 0.707106769 : f32
    %8 = vector.broadcast %cst_5 : f32 to vector<16x128xf32>
    %9 = arith.mulf %5, %8 : vector<16x128xf32>
    %10 = math.erf %9 : vector<16x128xf32>
    %cst_6 = arith.constant 1.000000e+00 : f32
    %11 = vector.broadcast %cst_6 : f32 to vector<16x128xf32>
    %12 = arith.addf %11, %10 : vector<16x128xf32>
    %13 = arith.mulf %7, %12 : vector<16x128xf32>
    %c0_7 = arith.constant 0 : index
    %c0_8 = arith.constant 0 : index
    %14 = vector.load %arg6[%c0_7, %c0_8] : memref<16x128xf32, #tpu.memory_space<vmem>>, vector<16x128xf32>
    %c0_9 = arith.constant 0 : index
    %c0_10 = arith.constant 0 : index
    %15 = vector.load %arg4[%c0_9, %c0_10] : memref<128x128xf32, #tpu.memory_space<vmem>>, vector<128x128xf32>
    %cst_11 = arith.constant dense<0.000000e+00> : vector<16x128xf32>
    %16 = tpu.matmul %13, %15, %cst_11 {dimension_numbers = #tpu.dot_dimension_numbers<[1], [0], [0], [1], [0, 0, 1, 1], [], []>} : vector<16x128xf32>, vector<128x128xf32>, vector<16x128xf32> -> vector<16x128xf32>
    %17 = arith.addf %14, %16 : vector<16x128xf32>
    %c0_12 = arith.constant 0 : index
    %c0_13 = arith.constant 0 : index
    %18 = vector.load %arg6[%c0_12, %c0_13] : memref<16x128xf32, #tpu.memory_space<vmem>>, vector<16x128xf32>
    tpu.vector_store %arg6[%c0_12, %c0_13], %17 {strides = array<i32>} : memref<16x128xf32, #tpu.memory_space<vmem>>, vector<16x128xf32>,
    %c0_i32_14 = arith.constant 0 : i32
    %19 = arith.cmpi eq, %arg1, %c0_i32_14 : i32
    %20 = arith.extui %19 : i1 to i32
    %c0_i32_15 = arith.constant 0 : i32
    %21 = arith.cmpi ne, %20, %c0_i32_15 : i32
    scf.if %21 {
      %c0_16 = arith.constant 0 : index
      %c0_17 = arith.constant 0 : index
      %22 = vector.load %arg6[%c0_16, %c0_17] : memref<16x128xf32, #tpu.memory_space<vmem>>, vector<16x128xf32>
      %c0_18 = arith.constant 0 : index
      %c0_19 = arith.constant 0 : index
      %23 = vector.load %arg5[%c0_18, %c0_19] : memref<16x128xf32, #tpu.memory_space<vmem>>, vector<16x128xf32>
      tpu.vector_store %arg5[%c0_18, %c0_19], %22 {strides = array<i32>} : memref<16x128xf32, #tpu.memory_space<vmem>>, vector<16x128xf32>,
    } else {
    }
    return
  }
  func.func @transform_0(%arg0: i32, %arg1: i32) -> (i32, i32) {
    %c0_i32 = arith.constant 0 : i32
    %c0_i32_0 = arith.constant 0 : i32
    return %arg0, %c0_i32 : i32, i32
  }
  func.func @transform_1(%arg0: i32, %arg1: i32) -> (i32, i32) {
    %c0_i32 = arith.constant 0 : i32
    %c0_i32_0 = arith.constant 0 : i32
    return %c0_i32, %arg1 : i32, i32
  }
  func.func @transform_2(%arg0: i32, %arg1: i32) -> (i32, i32) {
    %c0_i32 = arith.constant 0 : i32
    %c0_i32_0 = arith.constant 0 : i32
    return %arg1, %c0_i32 : i32, i32
  }
  func.func @transform_3(%arg0: i32, %arg1: i32) -> (i32, i32) {
    %c0_i32 = arith.constant 0 : i32
    %c0_i32_0 = arith.constant 0 : i32
    return %arg0, %c0_i32 : i32, i32
  }
}

</mosaic_0001>

<bundles_post_ra>
// kernel: tpu_custom_call.1
= control target key start
LH: loop header
LB: loop body
LE: loop exit
PB: predicated region body
PF: predicated region fallthrough
CT: control target
= control target key end

     0   :  { %8 = vsyncpa [#allocation4], 0  ;;  %s654_s0 = inlined_call_operand.hbm [shape: f32[16,128], index: 0, kind: input, shape index: {}]   ;;  %s655_s1 = inlined_call_operand.hbm [shape: f32[128,128], index: 1, kind: input, shape index: {}]   ;;  %s656_s2 = inlined_call_operand.hbm [shape: f32[128,128], index: 2, kind: input, shape index: {}]   ;;  %s657_s3 = inlined_call_operand.hbm [shape: f32[16,128], index: 3, kind: output, shape index: {}]  }
   0x1   :  { %9 = vsyncpa [#allocation7], 0 }
   0x2   :  { %10 = vsyncpa [#allocation5], 0  ;;  %s561_s12 = smov [#allocation6]   ;;  %s562_s14 = smov [#allocation3]  }
   0x3   :  { %s28_s13 = sshll.u32 %s561_s12, 4  ;;  %s16_s15 = sshll.u32 %s562_s14, 4  ;;  %s29_s13 = int_to_ptr.vmem [resolvable:$true] %s28_s13  ;;  %s587_s15 = int_to_ptr.vmem [resolvable:$true] %s16_s15 }
   0x4   :  { %s467_s18 = scalar_lea.hbm %s655_s1, 2048 }
   0x5   :  { %p468_p0 = scmp.ne.s32.totalorder %s655_s1, %s467_s18  ;;  %p471_p1 = scmp.lt.u32.totalorder %s467_s18, %s655_s1 }
   0x7   :  { %p473_p2 = pnand %p471_p1, %p468_p0 }
   0x9   :  { %476 = shalt.err (!%p473_p2)
}
   0xa   :  { %s477_s23 = scalar_lea.vmem %s29_s13, 2048  ;;  %p482_p4 = scmp.lt.s32.totalorder %s29_s13, %s29_s13 }
   0xb   :  { %p478_p3 = scmp.ne.s32.totalorder %s29_s13, %s477_s23  ;;  %p483_p5 = scmp.lt.s32.totalorder %s477_s23, %s477_s23 }
   0xd   :  { %p484_p6 = por %p483_p5, %p482_p4 }
   0xf   :  { %p485_p7 = pnand %p484_p6, %p478_p3 }
  0x11   :  { %488 = shalt.err (!%p485_p7)
}
  0x12   :  { %s563_s24 = smov 128   ;;  %s564_s25 = smov 8  }
  0x13   :  { %34 = dma.hbm_to_vmem [thread:$0]  %s655_s1, 2048, %s29_s13, [#allocation7], %s563_s24, %s563_s24, %s564_s25  }
  0x14   :  { %s489_s30 = scalar_lea.hbm %s654_s0, 256 }
  0x15   :  { %p490_p8 = scmp.ne.s32.totalorder %s654_s0, %s489_s30  ;;  %p493_p9 = scmp.lt.u32.totalorder %s489_s30, %s654_s0 }
  0x17   :  { %p495_p10 = pnand %p493_p9, %p490_p8 }
  0x19   :  { %498 = shalt.err (!%p495_p10)
}
  0x1a   :  { %s499_s8 = scalar_lea.vmem %s587_s15, 256  ;;  %p504_p12 = scmp.lt.s32.totalorder %s587_s15, %s587_s15 }
  0x1b   :  { %p500_p11 = scmp.ne.s32.totalorder %s587_s15, %s499_s8  ;;  %p505_p13 = scmp.lt.s32.totalorder %s499_s8, %s499_s8 }
  0x1d   :  { %p506_p0 = por %p505_p13, %p504_p12 }
  0x1f   :  { %p507_p1 = pnand %p506_p0, %p500_p11 }
  0x21   :  { %510 = shalt.err (!%p507_p1)
}
  0x22   :  { %22 = dma.hbm_to_vmem [thread:$0]  %s654_s0, 256, %s587_s15, [#allocation4], %s563_s24, %s563_s24, %s564_s25  }
  0x23   :  { %s565_s10 = smov [#allocation8]   ;;  %s511_s14 = scalar_lea.hbm %s656_s2, 2048 }
  0x24   :  { %s40_s11 = sshll.u32 %s565_s10, 4  ;;  %p512_p2 = scmp.ne.s32.totalorder %s656_s2, %s511_s14  ;;  %s41_s11 = int_to_ptr.vmem [resolvable:$true] %s40_s11 }
  0x25   :  { %p515_p3 = scmp.lt.u32.totalorder %s511_s14, %s656_s2 }
  0x27   :  { %p517_p4 = pnand %p515_p3, %p512_p2 }
  0x29   :  { %520 = shalt.err (!%p517_p4)
}
  0x2a   :  { %s521_s20 = scalar_lea.vmem %s41_s11, 2048  ;;  %p526_p6 = scmp.lt.s32.totalorder %s41_s11, %s41_s11 }
  0x2b   :  { %p522_p5 = scmp.ne.s32.totalorder %s41_s11, %s521_s20  ;;  %p527_p7 = scmp.lt.s32.totalorder %s521_s20, %s521_s20 }
  0x2d   :  { %p528_p8 = por %p527_p7, %p526_p6 }
  0x2f   :  { %p529_p9 = pnand %p528_p8, %p522_p5 }
  0x31   :  { %532 = shalt.err (!%p529_p9)
}
  0x32   :  { %46 = dma.hbm_to_vmem [thread:$0]  %s656_s2, 2048, %s41_s11, [#allocation7], %s563_s24, %s563_s24, %s564_s25  }
  0x33   :  { %555 = dma.done.wait [#allocation4], 256  }
  0x34   :  { %556 = vsyncadd [#allocation4], 4294967040 }
  0x35   :  { %557 = dma.done.wait [#allocation7], 4096  }
  0x36   :  { %558 = vsyncadd [#allocation7], 4294963200  ;;  %v64_v0 = vld [vmem:[#allocation6] sm:$0xff]  ;;  %v65_v1 = vld [vmem:[#allocation6 + $0x8] sm:$0xff]  ;;  %s566_s2 = smov [#allocation9]  }
  0x37   :  { %v66_v2 = vld [vmem:[#allocation6 + $0x10] sm:$0xff]  ;;  %v393_v3 = vpack.c.bf16 %v65_v1, %v64_v0  ;;  %v67_v4 = vld [vmem:[#allocation6 + $0x18] sm:$0xff]  ;;  %v68_v6 = vld [vmem:[#allocation6 + $0x20] sm:$0xff]  ;;  %s274_s21 = sshll.u32 %s566_s2, 4  ;;  %s275_s21 = int_to_ptr.vmem [resolvable:$true] %s274_s21 }
  0x38   :  { %v397_v5 = vpack.c.bf16 %v67_v4, %v66_v2  ;;  %v69_v7 = vld [vmem:[#allocation6 + $0x28] sm:$0xff]  ;;  %v70_v9 = vld [vmem:[#allocation6 + $0x30] sm:$0xff]  ;;  %v71_v10 = vld [vmem:[#allocation6 + $0x38] sm:$0xff]  ;;  %s533_s22 = scalar_lea.vmem %s275_s21, 256  ;;  %p538_p11 = scmp.lt.s32.totalorder %s275_s21, %s275_s21 }
  0x39   :  { %394 = vmatprep.subr.bf16.mxu0 %v393_v3  ;;  %v401_v8 = vpack.c.bf16 %v69_v7, %v68_v6  ;;  %v62_v11 = vld [vmem:[#allocation3] sm:$0xff]  ;;  %v167_v12 = vld [vmem:[#allocation8] sm:$0xff]  ;;  %v168_v13 = vld [vmem:[#allocation8 + $0x8] sm:$0xff]  ;;  %v405_v20 = vpack.c.bf16 %v71_v10, %v70_v9  ;;  %p534_p10 = scmp.ne.s32.totalorder %s275_s21, %s533_s22  ;;  %p539_p12 = scmp.lt.s32.totalorder %s533_s22, %s533_s22 }
  0x3a   :  { %396 = vmatpush3.bf16.msra.mxu0 %v393_v3  ;;  %355 = vmatprep.mubr.f32.mxu0 %v62_v11  ;;  %v169_v14 = vld [vmem:[#allocation8 + $0x10] sm:$0xff]  ;;  %v425_v15 = vpack.c.bf16 %v168_v13, %v167_v12  ;;  %v170_v16 = vld [vmem:[#allocation8 + $0x18] sm:$0xff]  ;;  %v171_v18 = vld [vmem:[#allocation8 + $0x20] sm:$0xff] }
  0x3b   :  { %398 = vmatprep.subr.bf16.mxu0 %v397_v5  ;;  %v429_v17 = vpack.c.bf16 %v170_v16, %v169_v14  ;;  %v172_v19 = vld [vmem:[#allocation8 + $0x28] sm:$0xff]  ;;  %v72_v21 = vld [vmem:[#allocation6 + $0x40] sm:$0xff]  ;;  %v74_v25 = vld [vmem:[#allocation6 + $0x50] sm:$0xff]  ;;  %p540_p13 = por %p539_p12, %p538_p11 }
  0x3c   :  { %426 = vmatprep.subr.bf16.mxu1 %v425_v15  ;;  %v73_v22 = vld [vmem:[#allocation6 + $0x48] sm:$0xff]  ;;  %v433_v23 = vpack.c.bf16 %v172_v19, %v171_v18  ;;  %v75_v26 = vld [vmem:[#allocation6 + $0x58] sm:$0xff]  ;;  %v76_v28 = vld [vmem:[#allocation6 + $0x60] sm:$0xff] }
  0x3d   :  { %428 = vmatpush3.bf16.msra.mxu1 %v425_v15  ;;  %v409_v24 = vpack.c.bf16 %v73_v22, %v72_v21  ;;  %v413_v27 = vpack.c.bf16 %v75_v26, %v74_v25  ;;  %v77_v29 = vld [vmem:[#allocation6 + $0x68] sm:$0xff]  ;;  %v78_v31 = vld [vmem:[#allocation6 + $0x70] sm:$0xff]  ;;  %v79_v32 = vld [vmem:[#allocation6 + $0x78] sm:$0xff]  ;;  %p541_p0 = pnand %p540_p13, %p534_p10 }
  0x3e   :  { %400 = vmatpush3.bf16.msra.mxu0 %v397_v5  ;;  %430 = vmatprep.subr.bf16.mxu1 %v429_v17  ;;  %v417_v30 = vpack.c.bf16 %v77_v29, %v76_v28  ;;  %v421_v33 = vpack.c.bf16 %v79_v32, %v78_v31  ;;  %v63_v34 = vld [vmem:[#allocation3 + $0x8] sm:$0xff]  ;;  %v173_v35 = vld [vmem:[#allocation8 + $0x30] sm:$0xff]  ;;  %v175_v38 = vld [vmem:[#allocation8 + $0x40] sm:$0xff] }
  0x3f   :  { %402 = vmatprep.subr.bf16.mxu0 %v401_v8  ;;  %v174_v36 = vld [vmem:[#allocation8 + $0x38] sm:$0xff]  ;;  %v176_v39 = vld [vmem:[#allocation8 + $0x48] sm:$0xff]  ;;  %v177_v41 = vld [vmem:[#allocation8 + $0x50] sm:$0xff] }
  0x40   :  { %v437_v37 = vpack.c.bf16 %v174_v36, %v173_v35  ;;  %v441_v40 = vpack.c.bf16 %v176_v39, %v175_v38  ;;  %v178_v42 = vld [vmem:[#allocation8 + $0x58] sm:$0xff]  ;;  %v179_v44 = vld [vmem:[#allocation8 + $0x60] sm:$0xff]  ;;  %v180_v45 = vld [vmem:[#allocation8 + $0x68] sm:$0xff] }
  0x41   :  { %432 = vmatpush3.bf16.msra.mxu1 %v429_v17  ;;  %v445_v43 = vpack.c.bf16 %v178_v42, %v177_v41  ;;  %v449_v46 = vpack.c.bf16 %v180_v45, %v179_v44  ;;  %v181_v47 = vld [vmem:[#allocation8 + $0x70] sm:$0xff]  ;;  %v182_v48 = vld [vmem:[#allocation8 + $0x78] sm:$0xff] }
  0x42   :  { %404 = vmatpush3.bf16.msra.mxu0 %v401_v8  ;;  %434 = vmatprep.subr.bf16.mxu1 %v433_v23  ;;  %v453_v49 = vpack.c.bf16 %v182_v48, %v181_v47 }
  0x43   :  { %406 = vmatprep.subr.bf16.mxu0 %v405_v20 }
  0x45   :  { %436 = vmatpush3.bf16.msra.mxu1 %v433_v23 }
  0x46   :  { %408 = vmatpush3.bf16.msra.mxu0 %v405_v20  ;;  %438 = vmatprep.subr.bf16.mxu1 %v437_v37 }
  0x47   :  { %410 = vmatprep.subr.bf16.mxu0 %v409_v24 }
  0x49   :  { %440 = vmatpush3.bf16.msra.mxu1 %v437_v37 }
  0x4a   :  { %412 = vmatpush3.bf16.msra.mxu0 %v409_v24  ;;  %442 = vmatprep.subr.bf16.mxu1 %v441_v40 }
  0x4b   :  { %414 = vmatprep.subr.bf16.mxu0 %v413_v27 }
  0x4d   :  { %444 = vmatpush3.bf16.msra.mxu1 %v441_v40 }
  0x4e   :  { %416 = vmatpush3.bf16.msra.mxu0 %v413_v27  ;;  %446 = vmatprep.subr.bf16.mxu1 %v445_v43 }
  0x4f   :  { %418 = vmatprep.subr.bf16.mxu0 %v417_v30 }
  0x51   :  { %448 = vmatpush3.bf16.msra.mxu1 %v445_v43 }
  0x52   :  { %420 = vmatpush3.bf16.msra.mxu0 %v417_v30  ;;  %450 = vmatprep.subr.bf16.mxu1 %v449_v46 }
  0x53   :  { %422 = vmatprep.subr.bf16.mxu0 %v421_v33 }
  0x55   :  { %452 = vmatpush3.bf16.msra.mxu1 %v449_v46 }
  0x56   :  { %424 = vmatpush3.bf16.msra.mxu0 %v421_v33  ;;  %454 = vmatprep.subr.bf16.mxu1 %v453_v49 }
  0x59   :  { %356 = vmatmul.mubr.f32.vlgmr.msra.gmra.mrb[0].mxu0 %v63_v34  ;;  %456 = vmatpush3.bf16.msra.mxu1 %v453_v49 }
 0x12c   :  { %v357_v50 = vpop.f32.mrb[0].mxu0 }
 0x12d   :  { %v158_v51 = vmul.f32 0.70710677, %v357_v50  ;;  %v146_v52 = vpop.f32.mrb[1].mxu0  ;;  %v156_v59 = vmul.f32 0.5, %v357_v50 }
 0x12e   :  { %v157_v53 = vmul.f32 0.70710677, %v146_v52  ;;  %v155_v57 = vmul.f32 0.5, %v146_v52 }
 0x12f   :  { %463 = verf.f32 %v158_v51 }
 0x130   :  { %465 = verf.f32 %v157_v53 }
 0x139   :  { %v464_v54 = vpop.eup %463 }
 0x13a   :  { %v466_v55 = vpop.eup %465  ;;  %v162_v56 = vadd.f32 1.0, %v464_v54 }
 0x13b   :  { %v161_v58 = vadd.f32 1.0, %v466_v55 }
 0x13c   :  { %v164_v61 = vmul.f32 %v162_v56, %v156_v59 }
 0x13d   :  { %v163_v60 = vmul.f32 %v161_v58, %v155_v57 }
 0x13f   :  { %390 = vmatprep.mubr.f32.mxu1 %v163_v60 }
 0x140   :  { %391 = vmatmul.mubr.f32.vlgmr.msra.gmra.mrb[0].mxu1 %v164_v61 }
 0x213   :  { %v392_v62 = vpop.f32.mrb[0].mxu1 }
 0x214   :  { %268 = vst [vmem:[#allocation9 + $0x8] sm:$0xff] %v392_v62  ;;  %v249_v63 = vpop.f32.mrb[1].mxu1 }
 0x215   :  { %267 = vst [vmem:[#allocation9] sm:$0xff] %v249_v63 }
 0x216   :  { %544 = shalt.err (!%p541_p0)
}
 0x217   :  { %s545_s27 = scalar_lea.hbm %s657_s3, 256 }
 0x218   :  { %p546_p1 = scmp.ne.s32.totalorder %s657_s3, %s545_s27  ;;  %p549_p2 = scmp.lt.u32.totalorder %s545_s27, %s657_s3 }
 0x21a   :  { %p551_p3 = pnand %p549_p2, %p546_p1 }
 0x21c   :  { %554 = shalt.err (!%p551_p3)
}
 0x21d   :  { %280 = dma.vmem_to_hbm [thread:$0]  %s275_s21, 256, %s657_s3, [#allocation5], %s563_s24, %s563_s24, %s564_s25  }
 0x21e   :  { %559 = dma.done.wait [#allocation5], 256  }
 0x21f   :  { %560 = vsyncadd [#allocation5], 4294967040 }
 0x220   :  { %284 = vsyncpa [#allocation4], 1 }
 0x221   :  { %285 = vsyncpa [#allocation7], 1 }
 0x222   :  { %286 = vsyncpa [#allocation5], 1 }

</bundles_post_ra>
